<compile_context>
chip_gen: v5e
topology: v5e:2x2
jax: 0.10.0
libtpu: 0.0.40
codegen_flags: <defaults>
</compile_context>

<pallas_src>
import jax
import jax.numpy as jnp
from jax.experimental import pallas as pl
from jax.experimental.pallas import tpu as pltpu

# ---------------- model hyper-params (mirrors the PyTorch module) -------------
HIDDEN = 64          # hidden_size
N_LAYERS = 1
N_DIR = 1
EMB_DIM = 100        # bpemb_en.dim default
E_PAD = 128          # embedding dim zero-padded to a full lane width
VOCAB = 1000         # small synthetic vocab (stand-in for bpemb pretrained vectors)
N_CLASSES = 7
C_PAD = 128          # logits padded to a full 128-lane store

BATCH = 2
SEQ = 8


def gru_decision_kernel(xs_ref, wih_ref, bgi_ref, whh_ref, bhh_ref,
                        wdec_ref, bdec_ref, out_ref):
    """Input projection + full GRU recurrence + decision head, one invocation.

    xs_ref  : (S*B, E_PAD)  time-major embedded tokens, lanes E..127 zero.
    wih_ref : (E_PAD, 3H)   input weights [W_ir|W_iz|W_in]^T, rows E..127 zero.
    bgi_ref : (1, 3H)       folded input-side biases: [b_ir+b_hr | b_iz+b_hz | b_in].
    whh_ref : (H, 3H)       hidden weights [W_hr|W_hz|W_hn]^T (lane-concatenated).
    bhh_ref : (1, 3H)       zeros in r/z lanes, b_hn in n lanes.
    wdec_ref: (H, C_PAD)    decision head, zero-padded to 128 lanes.
    bdec_ref: (1, C_PAD)
    out_ref : (B, C_PAD)    padded logits (single unmasked lane-dense store).
    """
    H = whh_ref.shape[0]
    B = out_ref.shape[0]
    SB = xs_ref.shape[0]
    S = SB // B

    # --- preamble: ONE MXU pass computes every timestep's input projection ----
    gi = jnp.dot(xs_ref[...], wih_ref[...],
                 preferred_element_type=jnp.float32) + bgi_ref[...]      # (S*B, 3H)

    w_all = whh_ref[...]                                                  # (H, 3H)
    bhh = bhh_ref[...]                                                    # (1, 3H)

    # --- recurrence: one fused matmul + one sigmoid + one tanh per step -------
    h = jnp.zeros((B, H), jnp.float32)
    for t in range(S):                     # S=8, fully unrolled, static slices
        gi_t = gi[t * B:(t + 1) * B, :]                                   # (B, 3H)
        gh = jnp.dot(h, w_all, preferred_element_type=jnp.float32) + bhh  # (B, 3H)
        rz = jax.nn.sigmoid(gi_t[:, :2 * H] + gh[:, :2 * H])              # r|z in one go
        r = rz[:, :H]
        z = rz[:, H:2 * H]
        n = jnp.tanh(gi_t[:, 2 * H:] + r * gh[:, 2 * H:])                 # gh_n has b_hn
        h = (1.0 - z) * n + z * h

    # dropout(p=0.8) is identity in eval; decision = Linear(H, 7) padded to 128.
    out_ref[...] = (jnp.dot(h, wdec_ref[...], preferred_element_type=jnp.float32)
                    + bdec_ref[...])


def prepare_params(raw):
    """One-time parameter layout prep (run ONCE, outside the per-call jit path)."""
    H = HIDDEN
    wih, whh = raw["wih"], raw["whh"]            # (3H, E), (3H, H)  PyTorch layout
    bih, bhh = raw["bih"], raw["bhh"]            # (3H,), (3H,)

    # Embedding table zero-padded to 128 lanes so the gathered rows are lane-dense.
    emb_pad = jnp.zeros((VOCAB, E_PAD), jnp.float32).at[:, :EMB_DIM].set(raw["embedding"])

    # Input-projection weights (E_PAD, 3H); gate order along lanes is r|z|n.
    wih_pad = jnp.zeros((E_PAD, 3 * H), jnp.float32).at[:EMB_DIM, :].set(wih.T)

    # Folded input-side biases: r/z get b_ih + b_hh; n gets b_in only.
    bgi = jnp.concatenate([bih[:2 * H] + bhh[:2 * H], bih[2 * H:]]).reshape(1, 3 * H)

    # Hidden-to-hidden weights, lane-concatenated: whh.T == [W_hr.T | W_hz.T | W_hn.T].
    whh_all = whh.T                                                     # (H, 3H)

    # Hidden-side bias: zeros for r/z (already folded), b_hn kept (stays inside r*(...)).
    bhh_pad = jnp.zeros((1, 3 * H), jnp.float32).at[0, 2 * H:].set(bhh[2 * H:])

    # Decision head zero-padded to 128 output lanes.
    wdec_pad = jnp.zeros((H, C_PAD), jnp.float32).at[:, :N_CLASSES].set(raw["wdec"].T)
    bdec_pad = jnp.zeros((1, C_PAD), jnp.float32).at[:, :N_CLASSES].set(raw["bdec"])

    return {"embedding_pad": emb_pad, "wih_pad": wih_pad, "bgi": bgi,
            "whh_all": whh_all, "bhh_pad": bhh_pad,
            "wdec_pad": wdec_pad, "bdec_pad": bdec_pad}


def rnn_model_forward(x_ids, prep):
    """x_ids: (B, S) int32 token ids -> logits (B, 7). Eval-mode forward."""
    # Embedding gather (kept in XLA) on the pre-padded table -> already lane-dense.
    emb = jnp.take(prep["embedding_pad"], x_ids, axis=0)       # (B, S, E_PAD)
    B, S, _ = emb.shape
    xs = jnp.transpose(emb, (1, 0, 2)).reshape(S * B, E_PAD)   # time-major flat

    vmem = pl.BlockSpec(memory_space=pltpu.MemorySpace.VMEM)
    out = pl.pallas_call(
        gru_decision_kernel,
        out_shape=jax.ShapeDtypeStruct((B, C_PAD), jnp.float32),
        in_specs=[vmem] * 7,
        out_specs=vmem,
    )(xs, prep["wih_pad"], prep["bgi"], prep["whh_all"], prep["bhh_pad"],
      prep["wdec_pad"], prep["bdec_pad"])
    return out[:, :N_CLASSES]


def init_params(key):
    """Raw PyTorch-layout parameters (weight_ih_l0 (3H,E), weight_hh_l0 (3H,H), ...)."""
    ks = jax.random.split(key, 6)
    scale = 0.1
    embedding = scale * jax.random.normal(ks[0], (VOCAB, EMB_DIM), jnp.float32)
    wih = scale * jax.random.normal(ks[1], (3 * HIDDEN, EMB_DIM), jnp.float32)
    whh = scale * jax.random.normal(ks[2], (3 * HIDDEN, HIDDEN), jnp.float32)
    bih = scale * jax.random.normal(ks[3], (3 * HIDDEN,), jnp.float32)
    bhh = scale * jax.random.normal(ks[4], (3 * HIDDEN,), jnp.float32)
    wdec = scale * jax.random.normal(ks[5], (N_CLASSES, HIDDEN * N_LAYERS * N_DIR),
                                     jnp.float32)
    bdec = jnp.zeros((N_CLASSES,), jnp.float32)
    return {"embedding": embedding, "wih": wih, "whh": whh,
            "bih": bih, "bhh": bhh, "wdec": wdec, "bdec": bdec}


def reference_forward(x_ids, params):
    """Pure-JAX reference of the PyTorch forward (eval mode)."""
    embed = jnp.take(params["embedding"], x_ids, axis=0)        # (B, S, E)
    B, S, E = embed.shape
    H = HIDDEN
    wih, whh = params["wih"], params["whh"]
    bih, bhh = params["bih"], params["bhh"]
    h = jnp.zeros((B, H), jnp.float32)
    for t in range(S):
        x_t = embed[:, t, :]
        gi = x_t @ wih.T + bih
        gh = h @ whh.T + bhh
        r = jax.nn.sigmoid(gi[:, :H] + gh[:, :H])
        z = jax.nn.sigmoid(gi[:, H:2 * H] + gh[:, H:2 * H])
        n = jnp.tanh(gi[:, 2 * H:] + r * gh[:, 2 * H:])
        h = (1.0 - z) * n + z * h
    return h @ params["wdec"].T + params["bdec"]


if __name__ == "__main__":
    key = jax.random.PRNGKey(0)
    kp, kx = jax.random.split(key)
    params = init_params(kp)
    prep = prepare_params(params)          # one-time layout prep, off the hot path
    x = jax.random.randint(kx, (BATCH, SEQ), 0, VOCAB, dtype=jnp.int32)

    fwd = jax.jit(rnn_model_forward)
    logits = jax.block_until_ready(fwd(x, prep))

    ref = reference_forward(x, params)
    assert logits.shape == (BATCH, N_CLASSES)
    assert jnp.allclose(logits, ref, atol=1e-4, rtol=1e-4), (
        float(jnp.max(jnp.abs(logits - ref))))
    print("KERNEL_OK")
</pallas_src>

<mosaic_0001>
module attributes {stable_mosaic.version = 11 : i64} {
  func.func @gru_decision_kernel(%arg0: memref<16x128xf32, #tpu.memory_space<vmem>>, %arg1: memref<128x192xf32, #tpu.memory_space<vmem>>, %arg2: memref<1x192xf32, #tpu.memory_space<vmem>>, %arg3: memref<64x192xf32, #tpu.memory_space<vmem>>, %arg4: memref<1x192xf32, #tpu.memory_space<vmem>>, %arg5: memref<64x128xf32, #tpu.memory_space<vmem>>, %arg6: memref<1x128xf32, #tpu.memory_space<vmem>>, %arg7: memref<2x128xf32, #tpu.memory_space<vmem>>) attributes {dimension_semantics = [], scalar_prefetch = 0 : i64, scratch_operands = 0 : i64, tpu.core_type = #tpu.core_type<tc>} {
    %c0 = arith.constant 0 : index
    %c0_0 = arith.constant 0 : index
    %0 = vector.load %arg0[%c0, %c0_0] : memref<16x128xf32, #tpu.memory_space<vmem>>, vector<16x128xf32>
    %c0_1 = arith.constant 0 : index
    %c0_2 = arith.constant 0 : index
    %1 = vector.load %arg1[%c0_1, %c0_2] : memref<128x192xf32, #tpu.memory_space<vmem>>, vector<128x192xf32>
    %cst = arith.constant dense<0.000000e+00> : vector<16x192xf32>
    %2 = tpu.matmul %0, %1, %cst {dimension_numbers = #tpu.dot_dimension_numbers<[1], [0], [0], [1], [0, 0, 1, 1], [], []>} : vector<16x128xf32>, vector<128x192xf32>, vector<16x192xf32> -> vector<16x192xf32>
    %c0_3 = arith.constant 0 : index
    %c0_4 = arith.constant 0 : index
    %3 = vector.load %arg2[%c0_3, %c0_4] : memref<1x192xf32, #tpu.memory_space<vmem>>, vector<1x192xf32>
    %4 = vector.broadcast %3 : vector<1x192xf32> to vector<16x192xf32>
    %5 = arith.addf %2, %4 : vector<16x192xf32>
    %c0_5 = arith.constant 0 : index
    %c0_6 = arith.constant 0 : index
    %6 = vector.load %arg3[%c0_5, %c0_6] : memref<64x192xf32, #tpu.memory_space<vmem>>, vector<64x192xf32>
    %c0_7 = arith.constant 0 : index
    %c0_8 = arith.constant 0 : index
    %7 = vector.load %arg4[%c0_7, %c0_8] : memref<1x192xf32, #tpu.memory_space<vmem>>, vector<1x192xf32>
    %cst_9 = arith.constant 0.000000e+00 : f32
    %8 = vector.broadcast %cst_9 : f32 to vector<2x64xf32>
    %9 = vector.extract_strided_slice %5 {offsets = [0, 0], sizes = [2, 192], strides = [1, 1]} : vector<16x192xf32> to vector<2x192xf32>
    %cst_10 = arith.constant dense<0.000000e+00> : vector<2x192xf32>
    %10 = tpu.matmul %8, %6, %cst_10 {dimension_numbers = #tpu.dot_dimension_numbers<[1], [0], [0], [1], [0, 0, 1, 1], [], []>} : vector<2x64xf32>, vector<64x192xf32>, vector<2x192xf32> -> vector<2x192xf32>
    %11 = vector.broadcast %7 : vector<1x192xf32> to vector<2x192xf32>
    %12 = arith.addf %10, %11 : vector<2x192xf32>
    %13 = vector.extract_strided_slice %9 {offsets = [0, 0], sizes = [2, 128], strides = [1, 1]} : vector<2x192xf32> to vector<2x128xf32>
    %14 = vector.extract_strided_slice %12 {offsets = [0, 0], sizes = [2, 128], strides = [1, 1]} : vector<2x192xf32> to vector<2x128xf32>
    %15 = arith.addf %13, %14 : vector<2x128xf32>
    %16 = arith.negf %15 : vector<2x128xf32>
    %17 = math.exp %16 : vector<2x128xf32>
    %cst_11 = arith.constant 1.000000e+00 : f32
    %18 = vector.broadcast %cst_11 : f32 to vector<2x128xf32>
    %19 = arith.addf %18, %17 : vector<2x128xf32>
    %20 = arith.divf %18, %19 : vector<2x128xf32>
    %21 = vector.extract_strided_slice %20 {offsets = [0, 0], sizes = [2, 64], strides = [1, 1]} : vector<2x128xf32> to vector<2x64xf32>
    %22 = vector.extract_strided_slice %20 {offsets = [0, 64], sizes = [2, 64], strides = [1, 1]} : vector<2x128xf32> to vector<2x64xf32>
    %23 = vector.extract_strided_slice %9 {offsets = [0, 128], sizes = [2, 64], strides = [1, 1]} : vector<2x192xf32> to vector<2x64xf32>
    %24 = vector.extract_strided_slice %12 {offsets = [0, 128], sizes = [2, 64], strides = [1, 1]} : vector<2x192xf32> to vector<2x64xf32>
    %25 = arith.mulf %21, %24 : vector<2x64xf32>
    %26 = arith.addf %23, %25 : vector<2x64xf32>
    %27 = math.tanh %26 : vector<2x64xf32>
    %cst_12 = arith.constant 1.000000e+00 : f32
    %28 = vector.broadcast %cst_12 : f32 to vector<2x64xf32>
    %29 = arith.subf %28, %22 : vector<2x64xf32>
    %30 = arith.mulf %29, %27 : vector<2x64xf32>
    %31 = arith.mulf %22, %8 : vector<2x64xf32>
    %32 = arith.addf %30, %31 : vector<2x64xf32>
    %33 = vector.extract_strided_slice %5 {offsets = [2, 0], sizes = [2, 192], strides = [1, 1]} : vector<16x192xf32> to vector<2x192xf32>
    %cst_13 = arith.constant dense<0.000000e+00> : vector<2x192xf32>
    %34 = tpu.matmul %32, %6, %cst_13 {dimension_numbers = #tpu.dot_dimension_numbers<[1], [0], [0], [1], [0, 0, 1, 1], [], []>} : vector<2x64xf32>, vector<64x192xf32>, vector<2x192xf32> -> vector<2x192xf32>
    %35 = vector.broadcast %7 : vector<1x192xf32> to vector<2x192xf32>
    %36 = arith.addf %34, %35 : vector<2x192xf32>
    %37 = vector.extract_strided_slice %33 {offsets = [0, 0], sizes = [2, 128], strides = [1, 1]} : vector<2x192xf32> to vector<2x128xf32>
    %38 = vector.extract_strided_slice %36 {offsets = [0, 0], sizes = [2, 128], strides = [1, 1]} : vector<2x192xf32> to vector<2x128xf32>
    %39 = arith.addf %37, %38 : vector<2x128xf32>
    %40 = arith.negf %39 : vector<2x128xf32>
    %41 = math.exp %40 : vector<2x128xf32>
    %cst_14 = arith.constant 1.000000e+00 : f32
    %42 = vector.broadcast %cst_14 : f32 to vector<2x128xf32>
    %43 = arith.addf %42, %41 : vector<2x128xf32>
    %44 = arith.divf %42, %43 : vector<2x128xf32>
    %45 = vector.extract_strided_slice %44 {offsets = [0, 0], sizes = [2, 64], strides = [1, 1]} : vector<2x128xf32> to vector<2x64xf32>
    %46 = vector.extract_strided_slice %44 {offsets = [0, 64], sizes = [2, 64], strides = [1, 1]} : vector<2x128xf32> to vector<2x64xf32>
    %47 = vector.extract_strided_slice %33 {offsets = [0, 128], sizes = [2, 64], strides = [1, 1]} : vector<2x192xf32> to vector<2x64xf32>
    %48 = vector.extract_strided_slice %36 {offsets = [0, 128], sizes = [2, 64], strides = [1, 1]} : vector<2x192xf32> to vector<2x64xf32>
    %49 = arith.mulf %45, %48 : vector<2x64xf32>
    %50 = arith.addf %47, %49 : vector<2x64xf32>
    %51 = math.tanh %50 : vector<2x64xf32>
    %cst_15 = arith.constant 1.000000e+00 : f32
    %52 = vector.broadcast %cst_15 : f32 to vector<2x64xf32>
    %53 = arith.subf %52, %46 : vector<2x64xf32>
    %54 = arith.mulf %53, %51 : vector<2x64xf32>
    %55 = arith.mulf %46, %32 : vector<2x64xf32>
    %56 = arith.addf %54, %55 : vector<2x64xf32>
    %57 = vector.extract_strided_slice %5 {offsets = [4, 0], sizes = [2, 192], strides = [1, 1]} : vector<16x192xf32> to vector<2x192xf32>
    %cst_16 = arith.constant dense<0.000000e+00> : vector<2x192xf32>
    %58 = tpu.matmul %56, %6, %cst_16 {dimension_numbers = #tpu.dot_dimension_numbers<[1], [0], [0], [1], [0, 0, 1, 1], [], []>} : vector<2x64xf32>, vector<64x192xf32>, vector<2x192xf32> -> vector<2x192xf32>
    %59 = vector.broadcast %7 : vector<1x192xf32> to vector<2x192xf32>
    %60 = arith.addf %58, %59 : vector<2x192xf32>
    %61 = vector.extract_strided_slice %57 {offsets = [0, 0], sizes = [2, 128], strides = [1, 1]} : vector<2x192xf32> to vector<2x128xf32>
    %62 = vector.extract_strided_slice %60 {offsets = [0, 0], sizes = [2, 128], strides = [1, 1]} : vector<2x192xf32> to vector<2x128xf32>
    %63 = arith.addf %61, %62 : vector<2x128xf32>
    %64 = arith.negf %63 : vector<2x128xf32>
    %65 = math.exp %64 : vector<2x128xf32>
    %cst_17 = arith.constant 1.000000e+00 : f32
    %66 = vector.broadcast %cst_17 : f32 to vector<2x128xf32>
    %67 = arith.addf %66, %65 : vector<2x128xf32>
    %68 = arith.divf %66, %67 : vector<2x128xf32>
    %69 = vector.extract_strided_slice %68 {offsets = [0, 0], sizes = [2, 64], strides = [1, 1]} : vector<2x128xf32> to vector<2x64xf32>
    %70 = vector.extract_strided_slice %68 {offsets = [0, 64], sizes = [2, 64], strides = [1, 1]} : vector<2x128xf32> to vector<2x64xf32>
    %71 = vector.extract_strided_slice %57 {offsets = [0, 128], sizes = [2, 64], strides = [1, 1]} : vector<2x192xf32> to vector<2x64xf32>
    %72 = vector.extract_strided_slice %60 {offsets = [0, 128], sizes = [2, 64], strides = [1, 1]} : vector<2x192xf32> to vector<2x64xf32>
    %73 = arith.mulf %69, %72 : vector<2x64xf32>
    %74 = arith.addf %71, %73 : vector<2x64xf32>
    %75 = math.tanh %74 : vector<2x64xf32>
    %cst_18 = arith.constant 1.000000e+00 : f32
    %76 = vector.broadcast %cst_18 : f32 to vector<2x64xf32>
    %77 = arith.subf %76, %70 : vector<2x64xf32>
    %78 = arith.mulf %77, %75 : vector<2x64xf32>
    %79 = arith.mulf %70, %56 : vector<2x64xf32>
    %80 = arith.addf %78, %79 : vector<2x64xf32>
    %81 = vector.extract_strided_slice %5 {offsets = [6, 0], sizes = [2, 192], strides = [1, 1]} : vector<16x192xf32> to vector<2x192xf32>
    %cst_19 = arith.constant dense<0.000000e+00> : vector<2x192xf32>
    %82 = tpu.matmul %80, %6, %cst_19 {dimension_numbers = #tpu.dot_dimension_numbers<[1], [0], [0], [1], [0, 0, 1, 1], [], []>} : vector<2x64xf32>, vector<64x192xf32>, vector<2x192xf32> -> vector<2x192xf32>
    %83 = vector.broadcast %7 : vector<1x192xf32> to vector<2x192xf32>
    %84 = arith.addf %82, %83 : vector<2x192xf32>
    %85 = vector.extract_strided_slice %81 {offsets = [0, 0], sizes = [2, 128], strides = [1, 1]} : vector<2x192xf32> to vector<2x128xf32>
    %86 = vector.extract_strided_slice %84 {offsets = [0, 0], sizes = [2, 128], strides = [1, 1]} : vector<2x192xf32> to vector<2x128xf32>
    %87 = arith.addf %85, %86 : vector<2x128xf32>
    %88 = arith.negf %87 : vector<2x128xf32>
    %89 = math.exp %88 : vector<2x128xf32>
    %cst_20 = arith.constant 1.000000e+00 : f32
    %90 = vector.broadcast %cst_20 : f32 to vector<2x128xf32>
    %91 = arith.addf %90, %89 : vector<2x128xf32>
    %92 = arith.divf %90, %91 : vector<2x128xf32>
    %93 = vector.extract_strided_slice %92 {offsets = [0, 0], sizes = [2, 64], strides = [1, 1]} : vector<2x128xf32> to vector<2x64xf32>
    %94 = vector.extract_strided_slice %92 {offsets = [0, 64], sizes = [2, 64], strides = [1, 1]} : vector<2x128xf32> to vector<2x64xf32>
    %95 = vector.extract_strided_slice %81 {offsets = [0, 128], sizes = [2, 64], strides = [1, 1]} : vector<2x192xf32> to vector<2x64xf32>
    %96 = vector.extract_strided_slice %84 {offsets = [0, 128], sizes = [2, 64], strides = [1, 1]} : vector<2x192xf32> to vector<2x64xf32>
    %97 = arith.mulf %93, %96 : vector<2x64xf32>
    %98 = arith.addf %95, %97 : vector<2x64xf32>
    %99 = math.tanh %98 : vector<2x64xf32>
    %cst_21 = arith.constant 1.000000e+00 : f32
    %100 = vector.broadcast %cst_21 : f32 to vector<2x64xf32>
    %101 = arith.subf %100, %94 : vector<2x64xf32>
    %102 = arith.mulf %101, %99 : vector<2x64xf32>
    %103 = arith.mulf %94, %80 : vector<2x64xf32>
    %104 = arith.addf %102, %103 : vector<2x64xf32>
    %105 = vector.extract_strided_slice %5 {offsets = [8, 0], sizes = [2, 192], strides = [1, 1]} : vector<16x192xf32> to vector<2x192xf32>
    %cst_22 = arith.constant dense<0.000000e+00> : vector<2x192xf32>
    %106 = tpu.matmul %104, %6, %cst_22 {dimension_numbers = #tpu.dot_dimension_numbers<[1], [0], [0], [1], [0, 0, 1, 1], [], []>} : vector<2x64xf32>, vector<64x192xf32>, vector<2x192xf32> -> vector<2x192xf32>
    %107 = vector.broadcast %7 : vector<1x192xf32> to vector<2x192xf32>
    %108 = arith.addf %106, %107 : vector<2x192xf32>
    %109 = vector.extract_strided_slice %105 {offsets = [0, 0], sizes = [2, 128], strides = [1, 1]} : vector<2x192xf32> to vector<2x128xf32>
    %110 = vector.extract_strided_slice %108 {offsets = [0, 0], sizes = [2, 128], strides = [1, 1]} : vector<2x192xf32> to vector<2x128xf32>
    %111 = arith.addf %109, %110 : vector<2x128xf32>
    %112 = arith.negf %111 : vector<2x128xf32>
    %113 = math.exp %112 : vector<2x128xf32>
    %cst_23 = arith.constant 1.000000e+00 : f32
    %114 = vector.broadcast %cst_23 : f32 to vector<2x128xf32>
    %115 = arith.addf %114, %113 : vector<2x128xf32>
    %116 = arith.divf %114, %115 : vector<2x128xf32>
    %117 = vector.extract_strided_slice %116 {offsets = [0, 0], sizes = [2, 64], strides = [1, 1]} : vector<2x128xf32> to vector<2x64xf32>
    %118 = vector.extract_strided_slice %116 {offsets = [0, 64], sizes = [2, 64], strides = [1, 1]} : vector<2x128xf32> to vector<2x64xf32>
    %119 = vector.extract_strided_slice %105 {offsets = [0, 128], sizes = [2, 64], strides = [1, 1]} : vector<2x192xf32> to vector<2x64xf32>
    %120 = vector.extract_strided_slice %108 {offsets = [0, 128], sizes = [2, 64], strides = [1, 1]} : vector<2x192xf32> to vector<2x64xf32>
    %121 = arith.mulf %117, %120 : vector<2x64xf32>
    %122 = arith.addf %119, %121 : vector<2x64xf32>
    %123 = math.tanh %122 : vector<2x64xf32>
    %cst_24 = arith.constant 1.000000e+00 : f32
    %124 = vector.broadcast %cst_24 : f32 to vector<2x64xf32>
    %125 = arith.subf %124, %118 : vector<2x64xf32>
    %126 = arith.mulf %125, %123 : vector<2x64xf32>
    %127 = arith.mulf %118, %104 : vector<2x64xf32>
    %128 = arith.addf %126, %127 : vector<2x64xf32>
    %129 = vector.extract_strided_slice %5 {offsets = [10, 0], sizes = [2, 192], strides = [1, 1]} : vector<16x192xf32> to vector<2x192xf32>
    %cst_25 = arith.constant dense<0.000000e+00> : vector<2x192xf32>
    %130 = tpu.matmul %128, %6, %cst_25 {dimension_numbers = #tpu.dot_dimension_numbers<[1], [0], [0], [1], [0, 0, 1, 1], [], []>} : vector<2x64xf32>, vector<64x192xf32>, vector<2x192xf32> -> vector<2x192xf32>
    %131 = vector.broadcast %7 : vector<1x192xf32> to vector<2x192xf32>
    %132 = arith.addf %130, %131 : vector<2x192xf32>
    %133 = vector.extract_strided_slice %129 {offsets = [0, 0], sizes = [2, 128], strides = [1, 1]} : vector<2x192xf32> to vector<2x128xf32>
    %134 = vector.extract_strided_slice %132 {offsets = [0, 0], sizes = [2, 128], strides = [1, 1]} : vector<2x192xf32> to vector<2x128xf32>
    %135 = arith.addf %133, %134 : vector<2x128xf32>
    %136 = arith.negf %135 : vector<2x128xf32>
    %137 = math.exp %136 : vector<2x128xf32>
    %cst_26 = arith.constant 1.000000e+00 : f32
    %138 = vector.broadcast %cst_26 : f32 to vector<2x128xf32>
    %139 = arith.addf %138, %137 : vector<2x128xf32>
    %140 = arith.divf %138, %139 : vector<2x128xf32>
    %141 = vector.extract_strided_slice %140 {offsets = [0, 0], sizes = [2, 64], strides = [1, 1]} : vector<2x128xf32> to vector<2x64xf32>
    %142 = vector.extract_strided_slice %140 {offsets = [0, 64], sizes = [2, 64], strides = [1, 1]} : vector<2x128xf32> to vector<2x64xf32>
    %143 = vector.extract_strided_slice %129 {offsets = [0, 128], sizes = [2, 64], strides = [1, 1]} : vector<2x192xf32> to vector<2x64xf32>
    %144 = vector.extract_strided_slice %132 {offsets = [0, 128], sizes = [2, 64], strides = [1, 1]} : vector<2x192xf32> to vector<2x64xf32>
    %145 = arith.mulf %141, %144 : vector<2x64xf32>
    %146 = arith.addf %143, %145 : vector<2x64xf32>
    %147 = math.tanh %146 : vector<2x64xf32>
    %cst_27 = arith.constant 1.000000e+00 : f32
    %148 = vector.broadcast %cst_27 : f32 to vector<2x64xf32>
    %149 = arith.subf %148, %142 : vector<2x64xf32>
    %150 = arith.mulf %149, %147 : vector<2x64xf32>
    %151 = arith.mulf %142, %128 : vector<2x64xf32>
    %152 = arith.addf %150, %151 : vector<2x64xf32>
    %153 = vector.extract_strided_slice %5 {offsets = [12, 0], sizes = [2, 192], strides = [1, 1]} : vector<16x192xf32> to vector<2x192xf32>
    %cst_28 = arith.constant dense<0.000000e+00> : vector<2x192xf32>
    %154 = tpu.matmul %152, %6, %cst_28 {dimension_numbers = #tpu.dot_dimension_numbers<[1], [0], [0], [1], [0, 0, 1, 1], [], []>} : vector<2x64xf32>, vector<64x192xf32>, vector<2x192xf32> -> vector<2x192xf32>
    %155 = vector.broadcast %7 : vector<1x192xf32> to vector<2x192xf32>
    %156 = arith.addf %154, %155 : vector<2x192xf32>
    %157 = vector.extract_strided_slice %153 {offsets = [0, 0], sizes = [2, 128], strides = [1, 1]} : vector<2x192xf32> to vector<2x128xf32>
    %158 = vector.extract_strided_slice %156 {offsets = [0, 0], sizes = [2, 128], strides = [1, 1]} : vector<2x192xf32> to vector<2x128xf32>
    %159 = arith.addf %157, %158 : vector<2x128xf32>
    %160 = arith.negf %159 : vector<2x128xf32>
    %161 = math.exp %160 : vector<2x128xf32>
    %cst_29 = arith.constant 1.000000e+00 : f32
    %162 = vector.broadcast %cst_29 : f32 to vector<2x128xf32>
    %163 = arith.addf %162, %161 : vector<2x128xf32>
    %164 = arith.divf %162, %163 : vector<2x128xf32>
    %165 = vector.extract_strided_slice %164 {offsets = [0, 0], sizes = [2, 64], strides = [1, 1]} : vector<2x128xf32> to vector<2x64xf32>
    %166 = vector.extract_strided_slice %164 {offsets = [0, 64], sizes = [2, 64], strides = [1, 1]} : vector<2x128xf32> to vector<2x64xf32>
    %167 = vector.extract_strided_slice %153 {offsets = [0, 128], sizes = [2, 64], strides = [1, 1]} : vector<2x192xf32> to vector<2x64xf32>
    %168 = vector.extract_strided_slice %156 {offsets = [0, 128], sizes = [2, 64], strides = [1, 1]} : vector<2x192xf32> to vector<2x64xf32>
    %169 = arith.mulf %165, %168 : vector<2x64xf32>
    %170 = arith.addf %167, %169 : vector<2x64xf32>
    %171 = math.tanh %170 : vector<2x64xf32>
    %cst_30 = arith.constant 1.000000e+00 : f32
    %172 = vector.broadcast %cst_30 : f32 to vector<2x64xf32>
    %173 = arith.subf %172, %166 : vector<2x64xf32>
    %174 = arith.mulf %173, %171 : vector<2x64xf32>
    %175 = arith.mulf %166, %152 : vector<2x64xf32>
    %176 = arith.addf %174, %175 : vector<2x64xf32>
    %177 = vector.extract_strided_slice %5 {offsets = [14, 0], sizes = [2, 192], strides = [1, 1]} : vector<16x192xf32> to vector<2x192xf32>
    %cst_31 = arith.constant dense<0.000000e+00> : vector<2x192xf32>
    %178 = tpu.matmul %176, %6, %cst_31 {dimension_numbers = #tpu.dot_dimension_numbers<[1], [0], [0], [1], [0, 0, 1, 1], [], []>} : vector<2x64xf32>, vector<64x192xf32>, vector<2x192xf32> -> vector<2x192xf32>
    %179 = vector.broadcast %7 : vector<1x192xf32> to vector<2x192xf32>
    %180 = arith.addf %178, %179 : vector<2x192xf32>
    %181 = vector.extract_strided_slice %177 {offsets = [0, 0], sizes = [2, 128], strides = [1, 1]} : vector<2x192xf32> to vector<2x128xf32>
    %182 = vector.extract_strided_slice %180 {offsets = [0, 0], sizes = [2, 128], strides = [1, 1]} : vector<2x192xf32> to vector<2x128xf32>
    %183 = arith.addf %181, %182 : vector<2x128xf32>
    %184 = arith.negf %183 : vector<2x128xf32>
    %185 = math.exp %184 : vector<2x128xf32>
    %cst_32 = arith.constant 1.000000e+00 : f32
    %186 = vector.broadcast %cst_32 : f32 to vector<2x128xf32>
    %187 = arith.addf %186, %185 : vector<2x128xf32>
    %188 = arith.divf %186, %187 : vector<2x128xf32>
    %189 = vector.extract_strided_slice %188 {offsets = [0, 0], sizes = [2, 64], strides = [1, 1]} : vector<2x128xf32> to vector<2x64xf32>
    %190 = vector.extract_strided_slice %188 {offsets = [0, 64], sizes = [2, 64], strides = [1, 1]} : vector<2x128xf32> to vector<2x64xf32>
    %191 = vector.extract_strided_slice %177 {offsets = [0, 128], sizes = [2, 64], strides = [1, 1]} : vector<2x192xf32> to vector<2x64xf32>
    %192 = vector.extract_strided_slice %180 {offsets = [0, 128], sizes = [2, 64], strides = [1, 1]} : vector<2x192xf32> to vector<2x64xf32>
    %193 = arith.mulf %189, %192 : vector<2x64xf32>
    %194 = arith.addf %191, %193 : vector<2x64xf32>
    %195 = math.tanh %194 : vector<2x64xf32>
    %cst_33 = arith.constant 1.000000e+00 : f32
    %196 = vector.broadcast %cst_33 : f32 to vector<2x64xf32>
    %197 = arith.subf %196, %190 : vector<2x64xf32>
    %198 = arith.mulf %197, %195 : vector<2x64xf32>
    %199 = arith.mulf %190, %176 : vector<2x64xf32>
    %200 = arith.addf %198, %199 : vector<2x64xf32>
    %c0_34 = arith.constant 0 : index
    %c0_35 = arith.constant 0 : index
    %201 = vector.load %arg5[%c0_34, %c0_35] : memref<64x128xf32, #tpu.memory_space<vmem>>, vector<64x128xf32>
    %cst_36 = arith.constant dense<0.000000e+00> : vector<2x128xf32>
    %202 = tpu.matmul %200, %201, %cst_36 {dimension_numbers = #tpu.dot_dimension_numbers<[1], [0], [0], [1], [0, 0, 1, 1], [], []>} : vector<2x64xf32>, vector<64x128xf32>, vector<2x128xf32> -> vector<2x128xf32>
    %c0_37 = arith.constant 0 : index
    %c0_38 = arith.constant 0 : index
    %203 = vector.load %arg6[%c0_37, %c0_38] : memref<1x128xf32, #tpu.memory_space<vmem>>, vector<1x128xf32>
    %204 = vector.broadcast %203 : vector<1x128xf32> to vector<2x128xf32>
    %205 = arith.addf %202, %204 : vector<2x128xf32>
    %c0_39 = arith.constant 0 : index
    %c0_40 = arith.constant 0 : index
    %206 = vector.load %arg7[%c0_39, %c0_40] : memref<2x128xf32, #tpu.memory_space<vmem>>, vector<2x128xf32>
    tpu.vector_store %arg7[%c0_39, %c0_40], %205 {strides = array<i32>} : memref<2x128xf32, #tpu.memory_space<vmem>>, vector<2x128xf32>,
    return
  }
}

</mosaic_0001>

<bundles_post_ra>
// kernel: rnn_model_forward.1
= control target key start
LH: loop header
LB: loop body
LE: loop exit
PB: predicated region body
PF: predicated region fallthrough
CT: control target
= control target key end

     0   :  { %s1434_s0 = inlined_call_operand.vmem [shape: f32[16,128], index: 0, kind: input, shape index: {}]   ;;  %s1435_s1 = inlined_call_operand.vmem [shape: f32[128,192], index: 1, kind: input, shape index: {}]   ;;  %s1436_s2 = inlined_call_operand.vmem [shape: f32[1,192], index: 2, kind: input, shape index: {}]   ;;  %s1437_s3 = inlined_call_operand.vmem [shape: f32[64,192], index: 3, kind: input, shape index: {}]   ;;  %s1438_s4 = inlined_call_operand.vmem [shape: f32[1,192], index: 4, kind: input, shape index: {}]   ;;  %s1439_s5 = inlined_call_operand.vmem [shape: f32[64,128], index: 5, kind: input, shape index: {}]   ;;  %s1440_s6 = inlined_call_operand.vmem [shape: f32[1,128], index: 6, kind: input, shape index: {}]   ;;  %s1441_s7 = inlined_call_operand.hbm [shape: f32[2,128], index: 7, kind: output, shape index: {}]  }
   0x1   :  { %v59_v0 = vld [vmem:[%s1435_s1 + $0xf0] sm:$0xff]  ;;  %v57_v1 = vld [vmem:[%s1435_s1 + $0xe0] sm:$0xff]  ;;  %v60_v11 = vld [vmem:[%s1435_s1 + $0xf8] sm:$0xff] }
   0x2   :  { %67 = vmatpush.msra.mxu0 %v59_v0  ;;  %v55_v2 = vld [vmem:[%s1435_s1 + $0xd0] sm:$0xff]  ;;  %v1012_v4 = vld [vmem:[%s1437_s3 + $0x60] sm:$0xff]  ;;  %v58_v12 = vld [vmem:[%s1435_s1 + $0xe8] sm:$0xff]  ;;  %90 = vmatpush.msra.mxu1 %v60_v11 }
   0x3   :  { %v1007_v3 = vld [vmem:[%s1437_s3 + $0x70] sm:$0xff]  ;;  %v53_v5 = vld [vmem:[%s1435_s1 + $0xc0] sm:$0xff]  ;;  %v1059_v15 = vld [vmem:[%s1437_s3 + $0x78] sm:$0xff] }
   0x4   :  { %68 = vmatpush.msra.mxu0 %v57_v1  ;;  %147 = vmatpush.msra.mxu2 %v1007_v3  ;;  %v1021_v6 = vld [vmem:[%s1437_s3 + $0x50] sm:$0xff]  ;;  %v1030_v8 = vld [vmem:[%s1437_s3 + $0x40] sm:$0xff]  ;;  %v56_v16 = vld [vmem:[%s1435_s1 + $0xd8] sm:$0xff] }
   0x5   :  { %v51_v7 = vld [vmem:[%s1435_s1 + $0xb0] sm:$0xff]  ;;  %v49_v9 = vld [vmem:[%s1435_s1 + $0xa0] sm:$0xff]  ;;  %v1068_v17 = vld [vmem:[%s1437_s3 + $0x68] sm:$0xff]  ;;  %91 = vmatpush.msra.mxu1 %v58_v12  ;;  %167 = vmatpush.msra.mxu3 %v1059_v15 }
   0x6   :  { %69 = vmatpush.msra.mxu0 %v55_v2  ;;  %148 = vmatpush.msra.mxu2 %v1012_v4  ;;  %v1039_v10 = vld [vmem:[%s1437_s3 + $0x30] sm:$0xff]  ;;  %v1054_v14 = vld [vmem:[%s1437_s3 + $0x20] sm:$0xff]  ;;  %v54_v20 = vld [vmem:[%s1435_s1 + $0xc8] sm:$0xff] }
   0x7   :  { %v47_v13 = vld [vmem:[%s1435_s1 + $0x90] sm:$0xff]  ;;  %v45_v18 = vld [vmem:[%s1435_s1 + $0x80] sm:$0xff]  ;;  %v1086_v21 = vld [vmem:[%s1437_s3 + $0x58] sm:$0xff]  ;;  %92 = vmatpush.msra.mxu1 %v56_v16  ;;  %168 = vmatpush.msra.mxu3 %v1068_v17 }
   0x8   :  { %70 = vmatpush.msra.mxu0 %v53_v5  ;;  %149 = vmatpush.msra.mxu2 %v1021_v6  ;;  %v1076_v19 = vld [vmem:[%s1437_s3 + $0x10] sm:$0xff]  ;;  %v1094_v23 = vld [vmem:[%s1437_s3] sm:$0xff]  ;;  %v52_v24 = vld [vmem:[%s1435_s1 + $0xb8] sm:$0xff] }
   0x9   :  { %v43_v22 = vld [vmem:[%s1435_s1 + $0x70] sm:$0xff]  ;;  %v41_v25 = vld [vmem:[%s1435_s1 + $0x60] sm:$0xff]  ;;  %93 = vmatpush.msra.mxu1 %v54_v20  ;;  %169 = vmatpush.msra.mxu3 %v1086_v21  ;;  %v1108_v26 = vld [vmem:[%s1437_s3 + $0x48] sm:$0xff] }
   0xa   :  { %71 = vmatpush.msra.mxu0 %v51_v7  ;;  %150 = vmatpush.msra.mxu2 %v1030_v8  ;;  %v50_v27 = vld [vmem:[%s1435_s1 + $0xa8] sm:$0xff] }
   0xc   :  { %72 = vmatpush.msra.mxu0 %v49_v9  ;;  %151 = vmatpush.msra.mxu2 %v1039_v10 }
   0xe   :  { %73 = vmatpush.msra.mxu0 %v47_v13  ;;  %152 = vmatpush.msra.mxu2 %v1054_v14 }
  0x10   :  { %74 = vmatpush.msra.mxu0 %v45_v18  ;;  %153 = vmatpush.msra.mxu2 %v1076_v19 }
  0x12   :  { %75 = vmatpush.msra.mxu0 %v43_v22  ;;  %154 = vmatpush.msra.mxu2 %v1094_v23 }
  0x13   :  { %12 = vsyncpa [#allocation3], 0  ;;  %v39_v28 = vld [vmem:[%s1435_s1 + $0x50] sm:$0xff]  ;;  %v952_v29 = vmov 0.0   ;;  %94 = vmatpush.msra.mxu1 %v52_v24  ;;  %v1120_v30 = vld [vmem:[%s1437_s3 + $0x38] sm:$0xff]  ;;  %170 = vmatpush.msra.mxu3 %v1108_v26  ;;  %vm135_vm4 = vcmask 523264  }
  0x14   :  { %155 = vmatmul.f32.vlgmr.msra.gmra.mxu2 %v952_v29  ;;  %76 = vmatpush.msra.mxu0 %v41_v25  ;;  %v48_v31 = vld [vmem:[%s1435_s1 + $0x98] sm:$0xff]  ;;  %v37_v32 = vld [vmem:[%s1435_s1 + $0x40] sm:$0xff]  ;;  %v1132_v33 = vld [vmem:[%s1437_s3 + $0x28] sm:$0xff]  ;;  %s954_s26 = smov [#allocation2]  }
  0x15   :  { %95 = vmatpush.msra.mxu1 %v50_v27  ;;  %223 = vmatpush.msrb.mxu2 %v1007_v3  ;;  %v46_v34 = vld [vmem:[%s1435_s1 + $0x88] sm:$0xff]  ;;  %v35_v35 = vld [vmem:[%s1435_s1 + $0x30] sm:$0xff]  ;;  %v1145_v36 = vld [vmem:[%s1437_s3 + $0x18] sm:$0xff]  ;;  %s840_s27 = sshll.u32 %s954_s26, 4  ;;  %s841_s27 = int_to_ptr.vmem [resolvable:$true] %s840_s27 }
  0x16   :  { %77 = vmatpush.msra.mxu0 %v39_v28  ;;  %171 = vmatpush.msra.mxu3 %v1120_v30  ;;  %v44_v37 = vld [vmem:[%s1435_s1 + $0x78] sm:$0xff]  ;;  %v33_v38 = vld [vmem:[%s1435_s1 + $0x20] sm:$0xff]  ;;  %v1158_v39 = vld [vmem:[%s1437_s3 + $0x8] sm:$0xff] }
  0x17   :  { %96 = vmatpush.msra.mxu1 %v48_v31  ;;  %224 = vmatpush.msrb.mxu2 %v1012_v4  ;;  %v42_v40 = vld [vmem:[%s1435_s1 + $0x68] sm:$0xff]  ;;  %v31_v41 = vld [vmem:[%s1435_s1 + $0x10] sm:$0xff]  ;;  %v40_v42 = vld [vmem:[%s1435_s1 + $0x58] sm:$0xff] }
  0x18   :  { %78 = vmatpush.msra.mxu0 %v37_v32  ;;  %172 = vmatpush.msra.mxu3 %v1132_v33  ;;  %v29_v43 = vld [vmem:[%s1435_s1] sm:$0xff]  ;;  %v38_v45 = vld [vmem:[%s1435_s1 + $0x48] sm:$0xff]  ;;  %v36_v46 = vld [vmem:[%s1435_s1 + $0x38] sm:$0xff] }
  0x19   :  { %97 = vmatpush.msra.mxu1 %v46_v34  ;;  %225 = vmatpush.msrb.mxu2 %v1021_v6  ;;  %v27_v44 = vld [vmem:[%s1434_s0] sm:$0xff]  ;;  %v34_v47 = vld [vmem:[%s1435_s1 + $0x28] sm:$0xff]  ;;  %v32_v48 = vld [vmem:[%s1435_s1 + $0x18] sm:$0xff] }
  0x1a   :  { %79 = vmatpush.msra.mxu0 %v35_v35  ;;  %173 = vmatpush.msra.mxu3 %v1145_v36  ;;  %v30_v49 = vld [vmem:[%s1435_s1 + $0x8] sm:$0xff]  ;;  %v129_v50 = vld [vmem:[%s1438_s4] sm:$0x3]  ;;  %s842_s1 = sshll.u32 %s1441_s7, 4  ;;  %s843_s1 = int_to_ptr.hbm [resolvable:$true] %s842_s1 }
  0x1b   :  { %98 = vmatpush.msra.mxu1 %v44_v37  ;;  %226 = vmatpush.msrb.mxu2 %v1030_v8  ;;  %v1260_v51 = vld [vmem:[%s1436_s2] sm:$0x3]  ;;  %v1262_v52 = vperm.slane %v129_v50, 0  ;;  %v1271_v0 = vperm.slane %v129_v50, 1  ;;  %s953_s2 = smov 64  }
  0x1c   :  { %80 = vmatpush.msra.mxu0 %v33_v38  ;;  %174 = vmatpush.msra.mxu3 %v1158_v39  ;;  %v63_v54 = vperm.slane %v1260_v51, 0  ;;  %v64_v11 = vperm.slane %v1260_v51, 1 }
  0x1d   :  { %99 = vmatpush.msra.mxu1 %v42_v40  ;;  %175 = vmatmul.f32.vlgmr.msra.gmra.mxu3 %v952_v29 }
  0x1e   :  { %81 = vmatpush.msra.mxu0 %v31_v41  ;;  %243 = vmatpush.msrb.mxu3 %v1059_v15 }
  0x1f   :  { %100 = vmatpush.msra.mxu1 %v40_v42  ;;  %227 = vmatpush.msrb.mxu2 %v1039_v10 }
  0x20   :  { %82 = vmatpush.msra.mxu0 %v29_v43  ;;  %244 = vmatpush.msrb.mxu3 %v1068_v17 }
  0x21   :  { %83 = vmatmul.f32.vlgmr.msra.gmra.mxu0 %v27_v44  ;;  %101 = vmatpush.msra.mxu1 %v38_v45 }
  0x22   :  { %245 = vmatpush.msrb.mxu3 %v1086_v21  ;;  %228 = vmatpush.msrb.mxu2 %v1054_v14 }
  0x23   :  { %102 = vmatpush.msra.mxu1 %v36_v46  ;;  %308 = vmatpush.msrb.mxu0 %v1007_v3 }
  0x24   :  { %246 = vmatpush.msrb.mxu3 %v1108_v26  ;;  %229 = vmatpush.msrb.mxu2 %v1076_v19 }
  0x25   :  { %103 = vmatpush.msra.mxu1 %v34_v47  ;;  %309 = vmatpush.msrb.mxu0 %v1012_v4 }
  0x26   :  { %247 = vmatpush.msrb.mxu3 %v1120_v30  ;;  %230 = vmatpush.msrb.mxu2 %v1094_v23 }
  0x27   :  { %104 = vmatpush.msra.mxu1 %v32_v48  ;;  %310 = vmatpush.msrb.mxu0 %v1021_v6 }
  0x28   :  { %248 = vmatpush.msrb.mxu3 %v1132_v33  ;;  %393 = vmatpush.msra.mxu2 %v1007_v3 }
  0x29   :  { %105 = vmatpush.msra.mxu1 %v30_v49  ;;  %311 = vmatpush.msrb.mxu0 %v1030_v8 }
  0x2a   :  { %106 = vmatmul.f32.vlgmr.msra.gmra.mxu1 %v27_v44  ;;  %249 = vmatpush.msrb.mxu3 %v1145_v36 }
  0x2b   :  { %328 = vmatpush.msrb.mxu1 %v1059_v15  ;;  %312 = vmatpush.msrb.mxu0 %v1039_v10 }
  0x2c   :  { %250 = vmatpush.msrb.mxu3 %v1158_v39  ;;  %394 = vmatpush.msra.mxu2 %v1012_v4 }
  0x2d   :  { %329 = vmatpush.msrb.mxu1 %v1068_v17  ;;  %313 = vmatpush.msrb.mxu0 %v1054_v14 }
  0x2e   :  { %413 = vmatpush.msra.mxu3 %v1059_v15  ;;  %395 = vmatpush.msra.mxu2 %v1021_v6 }
  0x2f   :  { %330 = vmatpush.msrb.mxu1 %v1086_v21  ;;  %314 = vmatpush.msrb.mxu0 %v1076_v19 }
  0x30   :  { %414 = vmatpush.msra.mxu3 %v1068_v17  ;;  %396 = vmatpush.msra.mxu2 %v1030_v8 }
  0x31   :  { %331 = vmatpush.msrb.mxu1 %v1108_v26  ;;  %315 = vmatpush.msrb.mxu0 %v1094_v23 }
  0x32   :  { %415 = vmatpush.msra.mxu3 %v1086_v21  ;;  %397 = vmatpush.msra.mxu2 %v1039_v10 }
  0x33   :  { %332 = vmatpush.msrb.mxu1 %v1120_v30  ;;  %478 = vmatpush.msra.mxu0 %v1007_v3 }
  0x34   :  { %416 = vmatpush.msra.mxu3 %v1108_v26  ;;  %398 = vmatpush.msra.mxu2 %v1054_v14 }
  0x35   :  { %333 = vmatpush.msrb.mxu1 %v1132_v33  ;;  %479 = vmatpush.msra.mxu0 %v1012_v4 }
  0x36   :  { %417 = vmatpush.msra.mxu3 %v1120_v30  ;;  %399 = vmatpush.msra.mxu2 %v1076_v19 }
  0x37   :  { %334 = vmatpush.msrb.mxu1 %v1145_v36  ;;  %480 = vmatpush.msra.mxu0 %v1021_v6 }
  0x38   :  { %418 = vmatpush.msra.mxu3 %v1132_v33  ;;  %400 = vmatpush.msra.mxu2 %v1094_v23 }
  0x39   :  { %335 = vmatpush.msrb.mxu1 %v1158_v39  ;;  %481 = vmatpush.msra.mxu0 %v1030_v8 }
  0x3a   :  { %419 = vmatpush.msra.mxu3 %v1145_v36 }
  0x3b   :  { %498 = vmatpush.msra.mxu1 %v1059_v15  ;;  %482 = vmatpush.msra.mxu0 %v1039_v10 }
  0x3c   :  { %420 = vmatpush.msra.mxu3 %v1158_v39 }
  0x3d   :  { %499 = vmatpush.msra.mxu1 %v1068_v17  ;;  %483 = vmatpush.msra.mxu0 %v1054_v14 }
  0x3f   :  { %500 = vmatpush.msra.mxu1 %v1086_v21  ;;  %484 = vmatpush.msra.mxu0 %v1076_v19 }
  0x41   :  { %501 = vmatpush.msra.mxu1 %v1108_v26  ;;  %485 = vmatpush.msra.mxu0 %v1094_v23 }
  0x43   :  { %502 = vmatpush.msra.mxu1 %v1120_v30 }
  0x45   :  { %503 = vmatpush.msra.mxu1 %v1132_v33 }
  0x47   :  { %504 = vmatpush.msra.mxu1 %v1145_v36 }
  0x49   :  { %505 = vmatpush.msra.mxu1 %v1158_v39 }
  0x97   :  { %v156_v53 = vpop.f32.mrf.mxu2 }
  0x98   :  { %v157_v55 = vadd.f32 %v156_v53, %v1262_v52 }
  0x9e   :  { %v84_v56 = vpop.f32.mrf.mxu0 }
  0x9f   :  { %v1268_v57 = vadd.f32 %v84_v56, %v63_v54 }
  0xa0   :  { %v176_v2 = vpop.f32.mrf.mxu3 }
  0xa1   :  { %v179_v58 = vadd.f32 %v157_v55, %v1268_v57  ;;  %v177_v13 = vadd.f32 %v176_v2, %v1271_v0 }
  0xa3   :  { %v851_v59 = vmul.f32 -1.442695, %v179_v58 }
  0xa5   :  { %878 = vpow2.f32 %v851_v59 }
  0xa7   :  { %v107_v12 = vpop.f32.mrf.mxu1 }
  0xa8   :  { %v1277_v22 = vadd.f32 %v107_v12, %v64_v11 }
  0xab   :  { %v879_v60 = vpop.eup %878 }
  0xac   :  { %v183_v61 = vadd.f32 1.0, %v879_v60 }
  0xae   :  { %880 = vrcp.f32 %v183_v61  ;;  %v195_v5 = vand.u32 2147483648, %v183_v61  ;;  %v193_v9 = vand.u32 2147483647, %v183_v61  ;;  %vm189_vm1 = vweird.f32 %v183_v61 }
  0xb0   :  { %v196_v18 = vor.u32 1.1754944e-38, %v195_v5  ;;  %vm194_vm3 = vcmp.eq.f32.partialorder %v193_v9, 8.507059e+37  ;;  %v28_v9 = vld [vmem:[%s1434_s0 + $0x8] sm:$0xff] }
  0xb1   :  { %86 = vmatmul.f32.gmra.mxu0 %v28_v9  ;;  %109 = vmatmul.f32.gmra.mxu1 %v28_v9 }
  0xb4   :  { %v881_v62 = vpop.eup %880 }
  0xb5   :  { %v185_v63 = vmul.f32 %v881_v62, %v183_v61  ;;  %vm190_vm0 = vweird.f32 %v881_v62 }
  0xb6   :  { %vm191_vm2 = vmor %vm189_vm1, %vm190_vm0 }
  0xb7   :  { %v186_v1 = vsub.f32 1.0, %v185_v63 }
  0xb9   :  { %v187_v7 = vmul.f32 %v881_v62, %v186_v1 }
  0xbb   :  { %v188_v16 = vadd.f32 %v881_v62, %v187_v7 }
  0xbd   :  { %v192_v20 = vsel %vm191_vm2, %v881_v62, %v188_v16 }
  0xbe   :  { %v197_v24 = vsel %vm194_vm3, %v196_v18, %v192_v20 }
  0xbf   :  { %v199_v25 = vmul.f32 %v197_v24, %v177_v13  ;;  %v202_v29 = vsub.f32 1.0, %v197_v24  ;;  %v208_v32 = vmul.f32 0.0, %v197_v24 }
  0xc1   :  { %v200_v27 = vadd.f32 %v199_v25, %v1277_v22 }
  0xc3   :  { %882 = vtanh.f32 %v200_v27 }
  0xc9   :  { %v883_v28 = vpop.eup %882 }
  0xca   :  { %204 = vrot.lane.b32.xlu0 %v883_v28, %s953_s2 }
 0x12e   :  { %v1327_v25 = vpop.f32.mrf.mxu0 }
 0x13c   :  { %v205_v31 = vpop.permute.xlu0 %204 }
 0x13d   :  { %v207_v34 = vmul.f32 %v205_v31, %v202_v29 }
 0x13f   :  { %v209_v35 = vadd.f32 %v208_v32, %v207_v34 }
 0x141   :  { %211 = vrot.lane.b32.xlu0 %v209_v35, %s953_s2  ;;  %v290_v60 = vrot.slane %v209_v35, 6  ;;  %v1331_v35 = vpop.f32.mrf.mxu1 }
 0x1b3   :  { %v212_v37 = vpop.permute.xlu0 %211 }
 0x1b4   :  { %852 = vmatmul.msk.f32.vlgmr.msrb.gmra.mxu2 %vm135_vm4, %v212_v37  ;;  %853 = vmatmul.msk.f32.vlgmr.msrb.gmra.mxu3 %vm135_vm4, %v212_v37 }
 0x1b5   :  { %555 = vmatpush.msrb.mxu2 %v1007_v3  ;;  %575 = vmatpush.msrb.mxu3 %v1059_v15 }
 0x1b7   :  { %556 = vmatpush.msrb.mxu2 %v1012_v4  ;;  %576 = vmatpush.msrb.mxu3 %v1068_v17 }
 0x1b9   :  { %557 = vmatpush.msrb.mxu2 %v1021_v6  ;;  %577 = vmatpush.msrb.mxu3 %v1086_v21 }
 0x1bb   :  { %558 = vmatpush.msrb.mxu2 %v1030_v8  ;;  %578 = vmatpush.msrb.mxu3 %v1108_v26 }
 0x1bd   :  { %559 = vmatpush.msrb.mxu2 %v1039_v10  ;;  %579 = vmatpush.msrb.mxu3 %v1120_v30 }
 0x1bf   :  { %560 = vmatpush.msrb.mxu2 %v1054_v14  ;;  %580 = vmatpush.msrb.mxu3 %v1132_v33 }
 0x1c1   :  { %561 = vmatpush.msrb.mxu2 %v1076_v19  ;;  %581 = vmatpush.msrb.mxu3 %v1145_v36 }
 0x1c3   :  { %562 = vmatpush.msrb.mxu2 %v1094_v23  ;;  %582 = vmatpush.msrb.mxu3 %v1158_v39 }
 0x237   :  { %v232_v38 = vpop.f32.mrf.mxu2  ;;  %v252_v48 = vpop.f32.mrf.mxu3 }
 0x238   :  { %v233_v40 = vadd.f32 %v232_v38, %v1262_v52  ;;  %v253_v53 = vadd.f32 %v252_v48, %v1271_v0 }
 0x23a   :  { %v256_v41 = vrot.slane %v233_v40, 6  ;;  %v279_v62 = vrot.slane %v253_v53, 6 }
 0x23c   :  { %v258_v42 = vadd.f32 %v256_v41, %v1268_v57 }
 0x23e   :  { %v854_v43 = vmul.f32 -1.442695, %v258_v42 }
 0x240   :  { %884 = vpow2.f32 %v854_v43 }
 0x246   :  { %v885_v44 = vpop.eup %884 }
 0x247   :  { %v262_v45 = vadd.f32 1.0, %v885_v44 }
 0x249   :  { %886 = vrcp.f32 %v262_v45  ;;  %v274_v50 = vand.u32 2147483648, %v262_v45  ;;  %v272_v56 = vand.u32 2147483647, %v262_v45  ;;  %vm268_vm6 = vweird.f32 %v262_v45 }
 0x24b   :  { %v275_v59 = vor.u32 1.1754944e-38, %v274_v50  ;;  %vm273_vm8 = vcmp.eq.f32.partialorder %v272_v56, 8.507059e+37 }
 0x24f   :  { %v887_v46 = vpop.eup %886 }
 0x250   :  { %v264_v47 = vmul.f32 %v887_v46, %v262_v45  ;;  %vm269_vm5 = vweird.f32 %v887_v46 }
 0x251   :  { %vm270_vm7 = vmor %vm268_vm6, %vm269_vm5 }
 0x252   :  { %v265_v49 = vsub.f32 1.0, %v264_v47 }
 0x254   :  { %v266_v55 = vmul.f32 %v887_v46, %v265_v49 }
 0x256   :  { %v267_v58 = vadd.f32 %v887_v46, %v266_v55 }
 0x258   :  { %v271_v61 = vsel %vm270_vm7, %v887_v46, %v267_v58 }
 0x259   :  { %v276_v63 = vsel %vm273_vm8, %v275_v59, %v271_v61 }
 0x25a   :  { %v281_v1 = vmul.f32 %v279_v62, %v276_v63  ;;  %v292_v2 = vmul.f32 %v290_v60, %v276_v63  ;;  %v284_v12 = vsub.f32 1.0, %v276_v63 }
 0x25c   :  { %v282_v5 = vadd.f32 %v281_v1, %v1277_v22 }
 0x25e   :  { %888 = vtanh.f32 %v282_v5 }
 0x264   :  { %v889_v7 = vpop.eup %888 }
 0x265   :  { %286 = vrot.lane.b32.xlu1 %v889_v7, %s953_s2 }
 0x2d7   :  { %v287_v13 = vpop.permute.xlu1 %286 }
 0x2d8   :  { %v289_v16 = vmul.f32 %v287_v13, %v284_v12 }
 0x2da   :  { %v293_v18 = vadd.f32 %v292_v2, %v289_v16 }
 0x2dc   :  { %v295_v20 = vrot.slane %v293_v18, 2  ;;  %v375_v49 = vrot.slane %v293_v18, 6 }
 0x2de   :  { %296 = vrot.lane.b32.xlu1 %v295_v20, %s953_s2 }
 0x350   :  { %v297_v24 = vpop.permute.xlu1 %296 }
 0x351   :  { %855 = vmatmul.msk.f32.vlgmr.msrb.gmra.mxu0 %vm135_vm4, %v297_v24  ;;  %856 = vmatmul.msk.f32.vlgmr.msrb.gmra.mxu1 %vm135_vm4, %v297_v24 }
 0x352   :  { %640 = vmatpush.msrb.mxu0 %v1007_v3  ;;  %660 = vmatpush.msrb.mxu1 %v1059_v15 }
 0x354   :  { %641 = vmatpush.msrb.mxu0 %v1012_v4  ;;  %661 = vmatpush.msrb.mxu1 %v1068_v17 }
 0x356   :  { %642 = vmatpush.msrb.mxu0 %v1021_v6  ;;  %662 = vmatpush.msrb.mxu1 %v1086_v21 }
 0x358   :  { %643 = vmatpush.msrb.mxu0 %v1030_v8  ;;  %663 = vmatpush.msrb.mxu1 %v1108_v26 }
 0x35a   :  { %644 = vmatpush.msrb.mxu0 %v1039_v10  ;;  %664 = vmatpush.msrb.mxu1 %v1120_v30 }
 0x35c   :  { %645 = vmatpush.msrb.mxu0 %v1054_v14  ;;  %665 = vmatpush.msrb.mxu1 %v1132_v33 }
 0x35e   :  { %646 = vmatpush.msrb.mxu0 %v1076_v19  ;;  %666 = vmatpush.msrb.mxu1 %v1145_v36 }
 0x360   :  { %647 = vmatpush.msrb.mxu0 %v1094_v23  ;;  %667 = vmatpush.msrb.mxu1 %v1158_v39 }
 0x3ce   :  { %v317_v27 = vpop.f32.mrf.mxu0  ;;  %v337_v41 = vpop.f32.mrf.mxu1 }
 0x3cf   :  { %v318_v28 = vadd.f32 %v317_v27, %v1262_v52  ;;  %v338_v44 = vadd.f32 %v337_v41, %v1271_v0 }
 0x3d1   :  { %v341_v29 = vrot.slane %v318_v28, 4  ;;  %v364_v53 = vrot.slane %v338_v44, 4 }
 0x3d3   :  { %v343_v31 = vadd.f32 %v341_v29, %v1268_v57 }
 0x3d5   :  { %v857_v32 = vmul.f32 -1.442695, %v343_v31 }
 0x3d7   :  { %890 = vpow2.f32 %v857_v32 }
 0x3dd   :  { %v891_v34 = vpop.eup %890 }
 0x3de   :  { %v347_v37 = vadd.f32 1.0, %v891_v34 }
 0x3e0   :  { %892 = vrcp.f32 %v347_v37  ;;  %v359_v43 = vand.u32 2147483648, %v347_v37  ;;  %v357_v46 = vand.u32 2147483647, %v347_v37  ;;  %vm353_vm10 = vweird.f32 %v347_v37 }
 0x3e2   :  { %v360_v48 = vor.u32 1.1754944e-38, %v359_v43  ;;  %vm358_vm12 = vcmp.eq.f32.partialorder %v357_v46, 8.507059e+37 }
 0x3e6   :  { %v893_v38 = vpop.eup %892 }
 0x3e7   :  { %v349_v40 = vmul.f32 %v893_v38, %v347_v37  ;;  %vm354_vm9 = vweird.f32 %v893_v38 }
 0x3e8   :  { %vm355_vm11 = vmor %vm353_vm10, %vm354_vm9 }
 0x3e9   :  { %v350_v42 = vsub.f32 1.0, %v349_v40 }
 0x3eb   :  { %v351_v45 = vmul.f32 %v893_v38, %v350_v42 }
 0x3ed   :  { %v352_v47 = vadd.f32 %v893_v38, %v351_v45 }
 0x3ef   :  { %v356_v50 = vsel %vm355_vm11, %v893_v38, %v352_v47 }
 0x3f0   :  { %v361_v55 = vsel %vm358_vm12, %v360_v48, %v356_v50 }
 0x3f1   :  { %v366_v56 = vmul.f32 %v364_v53, %v361_v55  ;;  %v377_v58 = vmul.f32 %v375_v49, %v361_v55  ;;  %v369_v61 = vsub.f32 1.0, %v361_v55 }
 0x3f3   :  { %v367_v59 = vadd.f32 %v366_v56, %v1277_v22 }
 0x3f5   :  { %894 = vtanh.f32 %v367_v59 }
 0x3fb   :  { %v895_v60 = vpop.eup %894 }
 0x3fc   :  { %371 = vrot.lane.b32.xlu2 %v895_v60, %s953_s2 }
 0x456   :  { %v372_v62 = vpop.permute.xlu2 %371 }
 0x457   :  { %v374_v63 = vmul.f32 %v372_v62, %v369_v61 }
 0x459   :  { %v378_v1 = vadd.f32 %v377_v58, %v374_v63  ;;  %v1374_v58 = vadd.f32 %v1331_v35, %v64_v11 }
 0x45b   :  { %v380_v2 = vrot.slane %v378_v1, 4 }
 0x45d   :  { %381 = vrot.lane.b32.xlu2 %v380_v2, %s953_s2 }
 0x4b7   :  { %v382_v5 = vpop.permute.xlu2 %381 }
 0x4b8   :  { %858 = vmatmul.msk.f32.vlgmr.msra.gmra.mxu2 %vm135_vm4, %v382_v5  ;;  %859 = vmatmul.msk.f32.vlgmr.msra.gmra.mxu3 %vm135_vm4, %v382_v5 }
 0x4b9   :  { %725 = vmatpush.msra.mxu2 %v1007_v3  ;;  %745 = vmatpush.msra.mxu3 %v1059_v15 }
 0x4bb   :  { %726 = vmatpush.msra.mxu2 %v1012_v4  ;;  %746 = vmatpush.msra.mxu3 %v1068_v17 }
 0x4bd   :  { %727 = vmatpush.msra.mxu2 %v1021_v6  ;;  %747 = vmatpush.msra.mxu3 %v1086_v21 }
 0x4bf   :  { %728 = vmatpush.msra.mxu2 %v1030_v8  ;;  %748 = vmatpush.msra.mxu3 %v1108_v26 }
 0x4c1   :  { %729 = vmatpush.msra.mxu2 %v1039_v10  ;;  %749 = vmatpush.msra.mxu3 %v1120_v30 }
 0x4c3   :  { %730 = vmatpush.msra.mxu2 %v1054_v14  ;;  %750 = vmatpush.msra.mxu3 %v1132_v33 }
 0x4c5   :  { %731 = vmatpush.msra.mxu2 %v1076_v19  ;;  %751 = vmatpush.msra.mxu3 %v1145_v36 }
 0x4c7   :  { %732 = vmatpush.msra.mxu2 %v1094_v23  ;;  %752 = vmatpush.msra.mxu3 %v1158_v39 }
 0x53b   :  { %v402_v3 = vpop.f32.mrf.mxu2  ;;  %v422_v19 = vpop.f32.mrf.mxu3 }
 0x53c   :  { %v403_v4 = vadd.f32 %v402_v3, %v1262_v52  ;;  %v423_v23 = vadd.f32 %v422_v19, %v1271_v0 }
 0x53e   :  { %v426_v6 = vrot.slane %v403_v4, 2  ;;  %v449_v12 = vrot.slane %v423_v23, 2 }
 0x540   :  { %v428_v8 = vadd.f32 %v426_v6, %v1268_v57  ;;  %v460_v57 = vrot.slane %v378_v1, 6 }
 0x542   :  { %v860_v10 = vmul.f32 -1.442695, %v428_v8 }
 0x544   :  { %896 = vpow2.f32 %v860_v10 }
 0x54a   :  { %v897_v15 = vpop.eup %896 }
 0x54b   :  { %v432_v14 = vadd.f32 1.0, %v897_v15 }
 0x54d   :  { %898 = vrcp.f32 %v432_v14  ;;  %v444_v30 = vand.u32 2147483648, %v432_v14  ;;  %v442_v36 = vand.u32 2147483647, %v432_v14  ;;  %vm438_vm14 = vweird.f32 %v432_v14 }
 0x54f   :  { %v445_v7 = vor.u32 1.1754944e-38, %v444_v30  ;;  %vm443_vm0 = vcmp.eq.f32.partialorder %v442_v36, 8.507059e+37 }
 0x553   :  { %v899_v17 = vpop.eup %898 }
 0x554   :  { %v434_v21 = vmul.f32 %v899_v17, %v432_v14  ;;  %vm439_vm13 = vweird.f32 %v899_v17 }
 0x555   :  { %vm440_vm15 = vmor %vm438_vm14, %vm439_vm13 }
 0x556   :  { %v435_v26 = vsub.f32 1.0, %v434_v21 }
 0x558   :  { %v436_v33 = vmul.f32 %v899_v17, %v435_v26 }
 0x55a   :  { %v437_v39 = vadd.f32 %v899_v17, %v436_v33 }
 0x55c   :  { %v441_v9 = vsel %vm440_vm15, %v899_v17, %v437_v39 }
 0x55d   :  { %v446_v13 = vsel %vm443_vm0, %v445_v7, %v441_v9 }
 0x55e   :  { %v451_v16 = vmul.f32 %v449_v12, %v446_v13  ;;  %v462_v18 = vmul.f32 %v460_v57, %v446_v13  ;;  %v454_v27 = vsub.f32 1.0, %v446_v13 }
 0x560   :  { %v452_v20 = vadd.f32 %v451_v16, %v1277_v22  ;;  %v1366_v22 = vadd.f32 %v1327_v25, %v63_v54 }
 0x562   :  { %900 = vtanh.f32 %v452_v20 }
 0x568   :  { %v901_v24 = vpop.eup %900 }
 0x569   :  { %456 = vrot.lane.b32.xlu0 %v901_v24, %s953_s2 }
 0x5db   :  { %v457_v28 = vpop.permute.xlu0 %456 }
 0x5dc   :  { %v459_v29 = vmul.f32 %v457_v28, %v454_v27 }
 0x5de   :  { %v463_v31 = vadd.f32 %v462_v18, %v459_v29 }
 0x5e0   :  { %v465_v32 = vrot.slane %v463_v31, 6 }
 0x5e2   :  { %466 = vrot.lane.b32.xlu1 %v465_v32, %s953_s2 }
 0x654   :  { %v467_v34 = vpop.permute.xlu1 %466 }
 0x655   :  { %861 = vmatmul.msk.f32.vlgmr.msra.gmra.mxu0 %vm135_vm4, %v467_v34  ;;  %862 = vmatmul.msk.f32.vlgmr.msra.gmra.mxu1 %vm135_vm4, %v467_v34 }
 0x6d2   :  { %v487_v37 = vpop.f32.mrf.mxu0  ;;  %v507_v50 = vpop.f32.mrf.mxu1 }
 0x6d3   :  { %v488_v38 = vadd.f32 %v487_v37, %v1262_v52  ;;  %v508_v25 = vadd.f32 %v507_v50, %v1271_v0 }
 0x6d5   :  { %v510_v40 = vadd.f32 %v488_v38, %v1366_v22 }
 0x6d7   :  { %v863_v41 = vmul.f32 -1.442695, %v510_v40 }
 0x6d9   :  { %902 = vpow2.f32 %v863_v41 }
 0x6df   :  { %v903_v42 = vpop.eup %902 }
 0x6e0   :  { %v514_v43 = vadd.f32 1.0, %v903_v42 }
 0x6e2   :  { %904 = vrcp.f32 %v514_v43  ;;  %v526_v47 = vand.u32 2147483648, %v514_v43  ;;  %v524_v49 = vand.u32 2147483647, %v514_v43  ;;  %vm520_vm2 = vweird.f32 %v514_v43 }
 0x6e4   :  { %v527_v54 = vor.u32 1.1754944e-38, %v526_v47  ;;  %vm525_vm5 = vcmp.eq.f32.partialorder %v524_v49, 8.507059e+37 }
 0x6e8   :  { %v905_v44 = vpop.eup %904 }
 0x6e9   :  { %v516_v45 = vmul.f32 %v905_v44, %v514_v43  ;;  %vm521_vm1 = vweird.f32 %v905_v44 }
 0x6ea   :  { %vm522_vm3 = vmor %vm520_vm2, %vm521_vm1 }
 0x6eb   :  { %v517_v46 = vsub.f32 1.0, %v516_v45 }
 0x6ed   :  { %v518_v48 = vmul.f32 %v905_v44, %v517_v46 }
 0x6ef   :  { %v519_v53 = vadd.f32 %v905_v44, %v518_v48 }
 0x6f1   :  { %v523_v55 = vsel %vm522_vm3, %v905_v44, %v519_v53 }
 0x6f2   :  { %v528_v56 = vsel %vm525_vm5, %v527_v54, %v523_v55 }
 0x6f3   :  { %v530_v59 = vmul.f32 %v528_v56, %v508_v25  ;;  %v533_v62 = vsub.f32 1.0, %v528_v56  ;;  %v540_v1 = vmul.f32 %v528_v56, %v465_v32 }
 0x6f5   :  { %v531_v60 = vadd.f32 %v530_v59, %v1374_v58 }
 0x6f7   :  { %906 = vtanh.f32 %v531_v60 }
 0x6fd   :  { %v907_v61 = vpop.eup %906 }
 0x6fe   :  { %535 = vrot.lane.b32.xlu2 %v907_v61, %s953_s2 }
 0x758   :  { %v536_v63 = vpop.permute.xlu2 %535 }
 0x759   :  { %v538_v2 = vmul.f32 %v536_v63, %v533_v62 }
 0x75b   :  { %v541_v5 = vadd.f32 %v540_v1, %v538_v2 }
 0x75d   :  { %543 = vrot.lane.b32.xlu0 %v541_v5, %s953_s2  ;;  %v622_v39 = vrot.slane %v541_v5, 6 }
 0x7cf   :  { %v544_v3 = vpop.permute.xlu0 %543 }
 0x7d0   :  { %864 = vmatmul.msk.f32.vlgmr.msrb.gmra.mxu2 %vm135_vm4, %v544_v3  ;;  %865 = vmatmul.msk.f32.vlgmr.msrb.gmra.mxu3 %vm135_vm4, %v544_v3 }
 0x853   :  { %v564_v51 = vpop.f32.mrf.mxu2  ;;  %v584_v17 = vpop.f32.mrf.mxu3 }
 0x854   :  { %v565_v11 = vadd.f32 %v564_v51, %v1262_v52  ;;  %v585_v26 = vadd.f32 %v584_v17, %v1271_v0 }
 0x856   :  { %v588_v35 = vrot.slane %v565_v11, 6  ;;  %v611_v57 = vrot.slane %v585_v26, 6 }
 0x858   :  { %v590_v4 = vadd.f32 %v588_v35, %v1366_v22 }
 0x85a   :  { %v866_v6 = vmul.f32 -1.442695, %v590_v4 }
 0x85c   :  { %908 = vpow2.f32 %v866_v6 }
 0x862   :  { %v909_v8 = vpop.eup %908 }
 0x863   :  { %v594_v10 = vadd.f32 1.0, %v909_v8 }
 0x865   :  { %910 = vrcp.f32 %v594_v10  ;;  %v606_v19 = vand.u32 2147483648, %v594_v10  ;;  %v604_v23 = vand.u32 2147483647, %v594_v10  ;;  %vm600_vm7 = vweird.f32 %v594_v10 }
 0x867   :  { %v607_v36 = vor.u32 1.1754944e-38, %v606_v19  ;;  %vm605_vm9 = vcmp.eq.f32.partialorder %v604_v23, 8.507059e+37 }
 0x86b   :  { %v911_v15 = vpop.eup %910 }
 0x86c   :  { %v596_v14 = vmul.f32 %v911_v15, %v594_v10  ;;  %vm601_vm6 = vweird.f32 %v911_v15 }
 0x86d   :  { %vm602_vm8 = vmor %vm600_vm7, %vm601_vm6 }
 0x86e   :  { %v597_v21 = vsub.f32 1.0, %v596_v14 }
 0x870   :  { %v598_v30 = vmul.f32 %v911_v15, %v597_v21 }
 0x872   :  { %v599_v33 = vadd.f32 %v911_v15, %v598_v30 }
 0x874   :  { %v603_v7 = vsel %vm602_vm8, %v911_v15, %v599_v33 }
 0x875   :  { %v608_v9 = vsel %vm605_vm9, %v607_v36, %v603_v7 }
 0x876   :  { %v613_v12 = vmul.f32 %v611_v57, %v608_v9  ;;  %v624_v13 = vmul.f32 %v622_v39, %v608_v9  ;;  %v616_v20 = vsub.f32 1.0, %v608_v9 }
 0x878   :  { %v614_v16 = vadd.f32 %v613_v12, %v1374_v58 }
 0x87a   :  { %912 = vtanh.f32 %v614_v16 }
 0x880   :  { %v913_v18 = vpop.eup %912 }
 0x881   :  { %618 = vrot.lane.b32.xlu1 %v913_v18, %s953_s2 }
 0x8f3   :  { %v619_v24 = vpop.permute.xlu1 %618 }
 0x8f4   :  { %v621_v27 = vmul.f32 %v619_v24, %v616_v20  ;;  %v802_v20 = vld [vmem:[%s1439_s5 + $0x30] sm:$0xff]  ;;  %v801_v24 = vld [vmem:[%s1439_s5 + $0x28] sm:$0xff] }
 0x8f6   :  { %v625_v28 = vadd.f32 %v624_v13, %v621_v27  ;;  %v799_v27 = vld [vmem:[%s1439_s5 + $0x18] sm:$0xff] }
 0x8f8   :  { %v627_v29 = vrot.slane %v625_v28, 2  ;;  %v707_v25 = vrot.slane %v625_v28, 6  ;;  %v798_v28 = vld [vmem:[%s1439_s5 + $0x10] sm:$0xff] }
 0x8fa   :  { %628 = vrot.lane.b32.xlu2 %v627_v29, %s953_s2  ;;  %v797_v29 = vld [vmem:[%s1439_s5 + $0x8] sm:$0xff] }
 0x954   :  { %v629_v31 = vpop.permute.xlu2 %628 }
 0x955   :  { %867 = vmatmul.msk.f32.vlgmr.msrb.gmra.mxu0 %vm135_vm4, %v629_v31  ;;  %868 = vmatmul.msk.f32.vlgmr.msrb.gmra.mxu1 %vm135_vm4, %v629_v31  ;;  %v796_v31 = vld [vmem:[%s1439_s5] sm:$0xff] }
 0x9d2   :  { %v649_v32 = vpop.f32.mrf.mxu0  ;;  %v669_v45 = vpop.f32.mrf.mxu1 }
 0x9d3   :  { %v650_v34 = vadd.f32 %v649_v32, %v1262_v52  ;;  %v670_v48 = vadd.f32 %v669_v45, %v1271_v0 }
 0x9d5   :  { %v673_v37 = vrot.slane %v650_v34, 4  ;;  %v696_v56 = vrot.slane %v670_v48, 4 }
 0x9d7   :  { %v675_v38 = vadd.f32 %v673_v37, %v1366_v22 }
 0x9d9   :  { %v869_v40 = vmul.f32 -1.442695, %v675_v38 }
 0x9db   :  { %914 = vpow2.f32 %v869_v40 }
 0x9e1   :  { %v915_v41 = vpop.eup %914 }
 0x9e2   :  { %v679_v42 = vadd.f32 1.0, %v915_v41 }
 0x9e4   :  { %916 = vrcp.f32 %v679_v42  ;;  %v691_v47 = vand.u32 2147483648, %v679_v42  ;;  %v689_v50 = vand.u32 2147483647, %v679_v42  ;;  %vm685_vm11 = vweird.f32 %v679_v42 }
 0x9e6   :  { %v692_v54 = vor.u32 1.1754944e-38, %v691_v47  ;;  %vm690_vm13 = vcmp.eq.f32.partialorder %v689_v50, 8.507059e+37 }
 0x9ea   :  { %v917_v43 = vpop.eup %916 }
 0x9eb   :  { %v681_v44 = vmul.f32 %v917_v43, %v679_v42  ;;  %vm686_vm10 = vweird.f32 %v917_v43  ;;  %v877_v42 = vld [vmem:[%s1440_s6] ss:$0 sm:$0xff] }
 0x9ec   :  { %vm687_vm12 = vmor %vm685_vm11, %vm686_vm10 }
 0x9ed   :  { %v682_v46 = vsub.f32 1.0, %v681_v44 }
 0x9ef   :  { %v683_v49 = vmul.f32 %v917_v43, %v682_v46 }
 0x9f1   :  { %v684_v53 = vadd.f32 %v917_v43, %v683_v49 }
 0x9f3   :  { %v688_v55 = vsel %vm687_vm12, %v917_v43, %v684_v53 }
 0x9f4   :  { %v693_v59 = vsel %vm690_vm13, %v692_v54, %v688_v55 }
 0x9f5   :  { %v698_v60 = vmul.f32 %v696_v56, %v693_v59  ;;  %v709_v61 = vmul.f32 %v707_v25, %v693_v59  ;;  %v701_v1 = vsub.f32 1.0, %v693_v59 }
 0x9f7   :  { %v699_v62 = vadd.f32 %v698_v60, %v1374_v58 }
 0x9f9   :  { %918 = vtanh.f32 %v699_v62 }
 0x9ff   :  { %v919_v63 = vpop.eup %918 }
 0xa00   :  { %703 = vrot.lane.b32.xlu0 %v919_v63, %s953_s2 }
 0xa72   :  { %v704_v2 = vpop.permute.xlu0 %703 }
 0xa73   :  { %v706_v5 = vmul.f32 %v704_v2, %v701_v1 }
 0xa75   :  { %v710_v3 = vadd.f32 %v709_v61, %v706_v5 }
 0xa77   :  { %v712_v51 = vrot.slane %v710_v3, 4 }
 0xa79   :  { %713 = vrot.lane.b32.xlu1 %v712_v51, %s953_s2 }
 0xaeb   :  { %v714_v11 = vpop.permute.xlu1 %713 }
 0xaec   :  { %870 = vmatmul.msk.f32.vlgmr.msra.gmra.mxu2 %vm135_vm4, %v714_v11  ;;  %871 = vmatmul.msk.f32.vlgmr.msra.gmra.mxu3 %vm135_vm4, %v714_v11 }
 0xb6f   :  { %v734_v35 = vpop.f32.mrf.mxu2  ;;  %v754_v19 = vpop.f32.mrf.mxu3 }
 0xb70   :  { %v735_v4 = vadd.f32 %v734_v35, %v1262_v52  ;;  %v755_v23 = vadd.f32 %v754_v19, %v1271_v0  ;;  %v803_v0 = vld [vmem:[%s1439_s5 + $0x38] sm:$0xff] }
 0xb71   :  { %822 = vmatpush.msra.mxu0 %v803_v0 }
 0xb72   :  { %v758_v6 = vrot.slane %v735_v4, 2  ;;  %v781_v57 = vrot.slane %v755_v23, 2 }
 0xb73   :  { %823 = vmatpush.msra.mxu0 %v802_v20 }
 0xb74   :  { %v760_v8 = vadd.f32 %v758_v6, %v1366_v22  ;;  %v792_v22 = vrot.slane %v710_v3, 6 }
 0xb75   :  { %824 = vmatpush.msra.mxu0 %v801_v24 }
 0xb76   :  { %v872_v10 = vmul.f32 -1.442695, %v760_v8 }
 0xb78   :  { %920 = vpow2.f32 %v872_v10 }
 0xb7e   :  { %v921_v15 = vpop.eup %920 }
 0xb7f   :  { %v764_v14 = vadd.f32 1.0, %v921_v15 }
 0xb81   :  { %922 = vrcp.f32 %v764_v14  ;;  %v776_v30 = vand.u32 2147483648, %v764_v14  ;;  %v774_v36 = vand.u32 2147483647, %v764_v14  ;;  %vm770_vm15 = vweird.f32 %v764_v14 }
 0xb83   :  { %v777_v52 = vor.u32 1.1754944e-38, %v776_v30  ;;  %vm775_vm1 = vcmp.eq.f32.partialorder %v774_v36, 8.507059e+37 }
 0xb87   :  { %v923_v17 = vpop.eup %922 }
 0xb88   :  { %v766_v21 = vmul.f32 %v923_v17, %v764_v14  ;;  %vm771_vm14 = vweird.f32 %v923_v17 }
 0xb89   :  { %vm772_vm0 = vmor %vm770_vm15, %vm771_vm14 }
 0xb8a   :  { %v767_v26 = vsub.f32 1.0, %v766_v21 }
 0xb8c   :  { %v768_v33 = vmul.f32 %v923_v17, %v767_v26 }
 0xb8e   :  { %v769_v39 = vadd.f32 %v923_v17, %v768_v33 }
 0xb90   :  { %v773_v7 = vsel %vm772_vm0, %v923_v17, %v769_v39 }
 0xb91   :  { %v778_v9 = vsel %vm775_vm1, %v777_v52, %v773_v7 }
 0xb92   :  { %v783_v12 = vmul.f32 %v781_v57, %v778_v9  ;;  %v794_v13 = vmul.f32 %v792_v22, %v778_v9  ;;  %v786_v32 = vsub.f32 1.0, %v778_v9 }
 0xb94   :  { %v784_v16 = vadd.f32 %v783_v12, %v1374_v58  ;;  %v800_v58 = vld [vmem:[%s1439_s5 + $0x20] sm:$0xff] }
 0xb95   :  { %825 = vmatpush.msra.mxu0 %v800_v58 }
 0xb96   :  { %924 = vtanh.f32 %v784_v16 }
 0xb97   :  { %826 = vmatpush.msra.mxu0 %v799_v27 }
 0xb99   :  { %827 = vmatpush.msra.mxu0 %v798_v28 }
 0xb9b   :  { %828 = vmatpush.msra.mxu0 %v797_v29 }
 0xb9c   :  { %v925_v18 = vpop.eup %924 }
 0xb9d   :  { %788 = vrot.lane.b32.xlu2 %v925_v18, %s953_s2  ;;  %829 = vmatpush.msra.mxu0 %v796_v31 }
 0xbf7   :  { %v789_v34 = vpop.permute.xlu2 %788 }
 0xbf8   :  { %v791_v37 = vmul.f32 %v789_v34, %v786_v32 }
 0xbfa   :  { %v795_v38 = vadd.f32 %v794_v13, %v791_v37 }
 0xbfc   :  { %v809_v40 = vrot.slane %v795_v38, 6 }
 0xbfe   :  { %810 = vrot.lane.b32.xlu0 %v809_v40, %s953_s2 }
 0xc70   :  { %v811_v41 = vpop.permute.xlu0 %810 }
 0xc71   :  { %873 = vmatmul.msk.f32.vlgmr.msra.gmra.mxu0 %vm135_vm4, %v811_v41 }
 0xcee   :  { %v831_v43 = vpop.f32.mrf.mxu0 }
 0xcef   :  { %v832_v44 = vadd.f32 %v877_v42, %v831_v43 }
 0xcf1   :  { %834 = vst [vmem:[#allocation2] sm:$0x3] %v832_v44 }
 0xcf2   :  { %845 = dma.vmem_to_hbm [thread:$0]  %s841_s27, 32, %s843_s1, [#allocation3]  }
 0xcf3   :  { %950 = dma.done.wait [#allocation3], 32  }
 0xcf4   :  { %951 = vsyncadd [#allocation3], 4294967264 }
 0xcf5   :  { %850 = vsyncpa [#allocation3], 1 }

</bundles_post_ra>
